<compile_context>
chip_gen: v7x
topology: tpu7x:2x2x1
jax: 0.10.0
libtpu: 0.0.40
codegen_flags: <defaults>
</compile_context>

<pallas_src>
import jax
import jax.numpy as jnp
from jax.experimental import pallas as pl
from jax.experimental.pallas import tpu as pltpu

IN_DIM = 28 * 28    # 784
HID_DIM = 128
OUT_DIM = 10
OUT_PAD = 128       # lane-dense padded output width
TB_DEFAULT = 1024   # batch tile rows (sweep 2048-4096 on v7x)


def _round_down(n, m):
    return (n // m) * m


def _choose_tb(B, tb):
    """Pick a batch tile: multiple of 16, <= B, and (if possible) >= 2 tiles."""
    if B < 16:
        # Single block covering the whole (tiny) batch; block dims equal the
        # full array dims, so the (8,128) divisibility rule is satisfied.
        return B
    TB = min(tb, _round_down(B, 16))
    if B >= 32:
        # Guarantee >= 2 grid steps so the "parallel" batch axis can shard
        # across both v7x TensorCores (harmless on v5e/v6e).
        TB = min(TB, max(16, _round_down(B // 2, 16)))
    return max(TB, 16)


def _mlp_kernel(x_ref, w1_ref, b1_ref, w2_ref, b2_ref, o_ref):
    # x arrives in its HBM dtype (f32); cast to bf16 in VMEM (free under DMA).
    x = x_ref[...].astype(jnp.bfloat16)
    # fc1: bf16 x bf16 MXU matmul, f32 accumulate; bias + relu in f32.
    h = jnp.dot(x, w1_ref[...], preferred_element_type=jnp.float32)
    h = jnp.maximum(h + b1_ref[...], 0.0)
    # fc2 (output padded to 128 lanes): bf16 x bf16 MXU matmul, f32 accumulate.
    out = jnp.dot(h.astype(jnp.bfloat16), w2_ref[...],
                  preferred_element_type=jnp.float32)
    o_ref[...] = (out + b2_ref[...]).astype(o_ref.dtype)


def simple_nn_forward(x, w1, b1, w2, b2, tb=TB_DEFAULT,
                      pad_out_dtype=jnp.bfloat16, return_padded=False):
    """x: any shape whose trailing dims flatten to 784 (e.g. (B,1,28,28)).

    w1: (784, 128) == PyTorch fc1.weight.T,  b1: (128,)
    w2: (128, 10)  == PyTorch fc2.weight.T,  b2: (10,)
    Returns (B, 10) float32  (or the (B, 128) padded buffer if return_padded).
    """
    x2d = x.reshape(-1, IN_DIM)           # no dtype cast, no padding pass
    B = x2d.shape[0]

    TB = _choose_tb(B, tb)
    grid = (pl.cdiv(B, TB),)               # ragged last block masked by Pallas

    # Small parameter preps (a few hundred KiB total) stay in the wrapper.
    w1_bf = w1.astype(jnp.bfloat16)
    w2_p = jnp.zeros((HID_DIM, OUT_PAD), jnp.bfloat16)
    w2_p = w2_p.at[:, :OUT_DIM].set(w2.astype(jnp.bfloat16))
    b1_2d = b1.reshape(1, HID_DIM).astype(jnp.float32)
    b2_p = jnp.zeros((1, OUT_PAD), jnp.float32)
    b2_p = b2_p.at[:, :OUT_DIM].set(b2.astype(jnp.float32))

    out_padded = pl.pallas_call(
        _mlp_kernel,
        out_shape=jax.ShapeDtypeStruct((B, OUT_PAD), pad_out_dtype),
        grid_spec=pl.GridSpec(
            grid=grid,
            in_specs=[
                # x: tiled over the batch axis (double-buffered by Pallas).
                pl.BlockSpec((TB, IN_DIM), lambda i: (i, 0)),
                # Weights / biases: constant block index -> fetched once.
                pl.BlockSpec((IN_DIM, HID_DIM), lambda i: (0, 0)),
                pl.BlockSpec((1, HID_DIM), lambda i: (0, 0)),
                pl.BlockSpec((HID_DIM, OUT_PAD), lambda i: (0, 0)),
                pl.BlockSpec((1, OUT_PAD), lambda i: (0, 0)),
            ],
            out_specs=pl.BlockSpec((TB, OUT_PAD), lambda i: (i, 0)),
        ),
        compiler_params=pltpu.CompilerParams(
            dimension_semantics=("parallel",)),
    )(x2d, w1_bf, b1_2d, w2_p, b2_p)

    if return_padded:
        return out_padded                  # (B, 128) bf16, no extra HBM pass
    return out_padded[:, :OUT_DIM].astype(jnp.float32)


def _reference_f32(x, w1, b1, w2, b2):
    x2d = x.reshape(-1, IN_DIM).astype(jnp.float32)
    h = jnp.maximum(x2d @ w1 + b1.reshape(1, -1), 0.0)
    return h @ w2 + b2.reshape(1, -1)


def _reference_bf16(x, w1, b1, w2, b2):
    # Same precision policy as the kernel (bf16 operands, f32 accumulate).
    x2d = x.reshape(-1, IN_DIM).astype(jnp.bfloat16)
    h = jnp.dot(x2d, w1.astype(jnp.bfloat16),
                preferred_element_type=jnp.float32)
    h = jnp.maximum(h + b1.reshape(1, -1).astype(jnp.float32), 0.0)
    out = jnp.dot(h.astype(jnp.bfloat16), w2.astype(jnp.bfloat16),
                  preferred_element_type=jnp.float32)
    return out + b2.reshape(1, -1).astype(jnp.float32)


if __name__ == "__main__":
    key = jax.random.PRNGKey(0)
    kx, k1, kb1, k2, kb2 = jax.random.split(key, 5)

    # B = 24 exercises a 2-step grid with a ragged last block (24 = 16 + 8).
    B = 24
    x = jax.random.normal(kx, (B, 1, 28, 28), dtype=jnp.float32)

    # Parameters stored transposed as (in, out) relative to nn.Linear.weight.
    w1 = jax.random.normal(k1, (IN_DIM, HID_DIM), dtype=jnp.float32) * 0.02
    b1 = jax.random.normal(kb1, (HID_DIM,), dtype=jnp.float32) * 0.02
    w2 = jax.random.normal(k2, (HID_DIM, OUT_DIM), dtype=jnp.float32) * 0.02
    b2 = jax.random.normal(kb2, (OUT_DIM,), dtype=jnp.float32) * 0.02

    fwd = jax.jit(simple_nn_forward)
    out = jax.block_until_ready(fwd(x, w1, b1, w2, b2))
    assert out.shape == (B, OUT_DIM)
    assert out.dtype == jnp.float32

    # Exact-policy reference (bf16 operands, f32 accumulate): tight tolerance.
    ref_bf16 = _reference_bf16(x, w1, b1, w2, b2)
    assert jnp.allclose(out, ref_bf16, atol=1e-2, rtol=1e-2)

    # Full-f32 reference: loose tolerance (bf16 quantization of x/w/output).
    ref_f32 = _reference_f32(x, w1, b1, w2, b2)
    assert jnp.allclose(out, ref_f32, atol=5e-2, rtol=5e-2)

    print("KERNEL_OK")
</pallas_src>

<mosaic_0001>
module attributes {stable_mosaic.version = 11 : i64} {
  func.func @_mlp_kernel(%arg0: i32, %arg1: memref<16x784xf32, #tpu.memory_space<vmem>>, %arg2: memref<784x128xbf16, #tpu.memory_space<vmem>>, %arg3: memref<1x128xf32, #tpu.memory_space<vmem>>, %arg4: memref<128x128xbf16, #tpu.memory_space<vmem>>, %arg5: memref<1x128xf32, #tpu.memory_space<vmem>>, %arg6: memref<16x128xbf16, #tpu.memory_space<vmem>>) attributes {dimension_semantics = [#tpu.dimension_semantics<parallel>], iteration_bounds = array<i64: 2>, scalar_prefetch = 0 : i64, scratch_operands = 0 : i64, tpu.core_type = #tpu.core_type<tc>, window_params = [{transform_indices = @transform_0, window_bounds = array<i64: 16, 784>}, {pipeline_mode = #tpu.pipeline_mode<synchronous>, transform_indices = @transform_1, window_bounds = array<i64: 784, 128>}, {pipeline_mode = #tpu.pipeline_mode<synchronous>, transform_indices = @transform_2, window_bounds = array<i64: 1, 128>}, {pipeline_mode = #tpu.pipeline_mode<synchronous>, transform_indices = @transform_3, window_bounds = array<i64: 128, 128>}, {pipeline_mode = #tpu.pipeline_mode<synchronous>, transform_indices = @transform_4, window_bounds = array<i64: 1, 128>}, {transform_indices = @transform_5, window_bounds = array<i64: 16, 128>}]} {
    %c0 = arith.constant 0 : index
    %c0_0 = arith.constant 0 : index
    %0 = vector.load %arg1[%c0, %c0_0] : memref<16x784xf32, #tpu.memory_space<vmem>>, vector<16x784xf32>
    %1 = arith.truncf %0 : vector<16x784xf32> to vector<16x784xbf16>
    %c0_1 = arith.constant 0 : index
    %c0_2 = arith.constant 0 : index
    %2 = vector.load %arg2[%c0_1, %c0_2] : memref<784x128xbf16, #tpu.memory_space<vmem>>, vector<784x128xbf16>
    %cst = arith.constant dense<0.000000e+00> : vector<16x128xf32>
    %3 = tpu.matmul %1, %2, %cst {dimension_numbers = #tpu.dot_dimension_numbers<[1], [0], [0], [1], [0, 0, 1, 1], [], []>} : vector<16x784xbf16>, vector<784x128xbf16>, vector<16x128xf32> -> vector<16x128xf32>
    %c0_3 = arith.constant 0 : index
    %c0_4 = arith.constant 0 : index
    %4 = vector.load %arg3[%c0_3, %c0_4] : memref<1x128xf32, #tpu.memory_space<vmem>>, vector<1x128xf32>
    %5 = vector.broadcast %4 : vector<1x128xf32> to vector<16x128xf32>
    %6 = arith.addf %3, %5 : vector<16x128xf32>
    %cst_5 = arith.constant 0.000000e+00 : f32
    %7 = vector.broadcast %cst_5 : f32 to vector<16x128xf32>
    %8 = arith.maximumf %6, %7 : vector<16x128xf32>
    %9 = arith.truncf %8 : vector<16x128xf32> to vector<16x128xbf16>
    %c0_6 = arith.constant 0 : index
    %c0_7 = arith.constant 0 : index
    %10 = vector.load %arg4[%c0_6, %c0_7] : memref<128x128xbf16, #tpu.memory_space<vmem>>, vector<128x128xbf16>
    %cst_8 = arith.constant dense<0.000000e+00> : vector<16x128xf32>
    %11 = tpu.matmul %9, %10, %cst_8 {dimension_numbers = #tpu.dot_dimension_numbers<[1], [0], [0], [1], [0, 0, 1, 1], [], []>} : vector<16x128xbf16>, vector<128x128xbf16>, vector<16x128xf32> -> vector<16x128xf32>
    %c0_9 = arith.constant 0 : index
    %c0_10 = arith.constant 0 : index
    %12 = vector.load %arg5[%c0_9, %c0_10] : memref<1x128xf32, #tpu.memory_space<vmem>>, vector<1x128xf32>
    %13 = vector.broadcast %12 : vector<1x128xf32> to vector<16x128xf32>
    %14 = arith.addf %11, %13 : vector<16x128xf32>
    %15 = arith.truncf %14 : vector<16x128xf32> to vector<16x128xbf16>
    %c0_11 = arith.constant 0 : index
    %c0_12 = arith.constant 0 : index
    %16 = vector.load %arg6[%c0_11, %c0_12] : memref<16x128xbf16, #tpu.memory_space<vmem>>, vector<16x128xbf16>
    tpu.vector_store %arg6[%c0_11, %c0_12], %15 {strides = array<i32>} : memref<16x128xbf16, #tpu.memory_space<vmem>>, vector<16x128xbf16>,
    return
  }
  func.func @transform_0(%arg0: i32) -> (i32, i32) {
    %c0_i32 = arith.constant 0 : i32
    %c0_i32_0 = arith.constant 0 : i32
    return %arg0, %c0_i32 : i32, i32
  }
  func.func @transform_1(%arg0: i32) -> (i32, i32) {
    %c0_i32 = arith.constant 0 : i32
    %c0_i32_0 = arith.constant 0 : i32
    %c0_i32_1 = arith.constant 0 : i32
    return %c0_i32, %c0_i32_0 : i32, i32
  }
  func.func @transform_2(%arg0: i32) -> (i32, i32) {
    %c0_i32 = arith.constant 0 : i32
    %c0_i32_0 = arith.constant 0 : i32
    %c0_i32_1 = arith.constant 0 : i32
    return %c0_i32, %c0_i32_0 : i32, i32
  }
  func.func @transform_3(%arg0: i32) -> (i32, i32) {
    %c0_i32 = arith.constant 0 : i32
    %c0_i32_0 = arith.constant 0 : i32
    %c0_i32_1 = arith.constant 0 : i32
    return %c0_i32, %c0_i32_0 : i32, i32
  }
  func.func @transform_4(%arg0: i32) -> (i32, i32) {
    %c0_i32 = arith.constant 0 : i32
    %c0_i32_0 = arith.constant 0 : i32
    %c0_i32_1 = arith.constant 0 : i32
    return %c0_i32, %c0_i32_0 : i32, i32
  }
  func.func @transform_5(%arg0: i32) -> (i32, i32) {
    %c0_i32 = arith.constant 0 : i32
    %c0_i32_0 = arith.constant 0 : i32
    return %arg0, %c0_i32 : i32, i32
  }
}

</mosaic_0001>

<bundles_post_ra>
// kernel: simple_nn_forward.1
= control target key start
LH: loop header
LB: loop body
LE: loop exit
PB: predicated region body
PF: predicated region fallthrough
CT: control target
= control target key end

     0   :  { %s1653_s18 = smov 0   ;;  %s1655_s19 = smov 0   ;;  %s1941_s0 = inlined_call_operand.vmem [shape: f32[24,784], index: 0, kind: input, shape index: {}]   ;;  %s1942_s1 = inlined_call_operand.vmem [shape: bf16[784,128], index: 1, kind: input, shape index: {}]   ;;  %s1943_s2 = inlined_call_operand.vmem [shape: f32[1,128], index: 2, kind: input, shape index: {}]   ;;  %s1944_s3 = inlined_call_operand.vmem [shape: bf16[128,128], index: 3, kind: input, shape index: {}]   ;;  %s1945_s4 = inlined_call_operand.vmem [shape: f32[1,128], index: 4, kind: input, shape index: {}]   ;;  %s1946_s5 = inlined_call_operand.vmem [shape: bf16[24,128], index: 5, kind: output, shape index: {}]  }
   0x1   :  { %s1657_s20 = smov 0  }
   0x2 LB: > { %s1666_s21 = sadd.s32 4294967295, %s1587_s20   ;;  %s1668_s22 = sadd.s32 1, %s1587_s20   ;;  %s1587_s20 = sphi %s1657_s20, %s1950_s20   ;;  %s1583_s19 = sphi %s1655_s19, %s1949_s19   ;;  %s1579_s18 = sphi %s1653_s18, %s1948_s18  }
   0x3   : > { %s129_s23 = ssub.s32 %s1587_s20, %s1668_s22  ;;  %s132_s24 = sadd.s32 1, %s1583_s19 }
   0x4   : > { %p130_p0 = scmp.eq.s32.totalorder %s129_s23, 0  ;;  %p142_p1 = scmp.ne.s32.totalorder %s1583_s19, %s1579_s18 }
   0x5   : > { %p143_p2 = scmp.eq.s32.totalorder %s1666_s21, 1  ;;  %p1189_p3 = scmp.ge.s32.totalorder %s1587_s20, 1 }
   0x6   : > { %s1676_s25 = scalar_select %p130_p0, %s1583_s19, %s132_s24  }
   0x7   : > { %p1678_p4 = por %p143_p2, %p142_p1  ;;  %p199_p5 = scmp.lt.s32.totalorder %s1587_s20, 3 }
   0x9   : > { %p200_p6 = pnand %p1189_p3, %p199_p5 }
   0xa   : > { %v1476_v0 = vld [vmem:[%s1942_s1 + $0x40] sm:$0xff] (!%p200_p6)   ;;  %v1480_v4 = vld [vmem:[%s1942_s1 + $0x48] sm:$0xff] (!%p200_p6)   ;;  %v1484_v8 = vld [vmem:[%s1942_s1 + $0x50] sm:$0xff] (!%p200_p6)   ;;  %s1725_s11 = sshll.u32 (!%p200_p6), %s1666_s21, 1  ;;  %v1621_v43 = vmov (!%p200_p6), 0.0   ;;  %vm1622_vm0 = vmmov (!%p200_p6), 0  }
   0xb   : > { %203 = sbr.rel (%p200_p6) target bundleno = 568 (0x238), region = 40  ;;  %v1477_v1 = vld [vmem:[%s1942_s1] sm:$0xff] (!%p200_p6)   ;;  %1282 = vmatprep.subr.bf16.mxu0 (!%p200_p6), %v1476_v0  ;;  %v1481_v5 = vld [vmem:[%s1942_s1 + $0x8] sm:$0xff] (!%p200_p6)   ;;  %v1485_v9 = vld [vmem:[%s1942_s1 + $0x10] sm:$0xff] (!%p200_p6)   ;;  %p238_p7 = scmp.lt.s32.totalorder (!%p200_p6), %s1725_s11, 2  ;;  %vm675_vm1 = vcmask (!%p200_p6), 130048  }
   0xc   : > { %v1478_v2 = vld [vmem:[%s1942_s1 + $0xc0] sm:$0xff] (!%p200_p6)   ;;  %1283 = vmatpush3.bf16.msra.mxu0 (!%p200_p6), %v1477_v1  ;;  %v1482_v6 = vld [vmem:[%s1942_s1 + $0xc8] sm:$0xff] (!%p200_p6)   ;;  %v1486_v10 = vld [vmem:[%s1942_s1 + $0xd0] sm:$0xff] (!%p200_p6)  }
   0xd   : > { %v1479_v3 = vld [vmem:[%s1942_s1 + $0x80] sm:$0xff] (!%p200_p6)   ;;  %1304 = vmatprep.subr.bf16.mxu1 (!%p200_p6), %v1478_v2  ;;  %1284 = vmatprep.subr.bf16.mxu0 (!%p200_p6), %v1480_v4  ;;  %v1483_v7 = vld [vmem:[%s1942_s1 + $0x88] sm:$0xff] (!%p200_p6)   ;;  %v1487_v11 = vld [vmem:[%s1942_s1 + $0x90] sm:$0xff] (!%p200_p6)  }
   0xe   : > { %1305 = vmatpush3.bf16.msra.mxu1 (!%p200_p6), %v1479_v3  ;;  %v1488_v12 = vld [vmem:[%s1942_s1 + $0x58] sm:$0xff] (!%p200_p6)   ;;  %v1492_v16 = vld [vmem:[%s1942_s1 + $0x60] sm:$0xff] (!%p200_p6)   ;;  %v1496_v20 = vld [vmem:[%s1942_s1 + $0x68] sm:$0xff] (!%p200_p6)  }
   0xf   : > { %1306 = vmatprep.subr.bf16.mxu1 (!%p200_p6), %v1482_v6  ;;  %v1489_v13 = vld [vmem:[%s1942_s1 + $0x18] sm:$0xff] (!%p200_p6)   ;;  %v1493_v17 = vld [vmem:[%s1942_s1 + $0x20] sm:$0xff] (!%p200_p6)   ;;  %v1497_v21 = vld [vmem:[%s1942_s1 + $0x28] sm:$0xff] (!%p200_p6)  }
  0x10   : > { %1285 = vmatpush3.bf16.msra.mxu0 (!%p200_p6), %v1481_v5  ;;  %v1490_v14 = vld [vmem:[%s1942_s1 + $0xd8] sm:$0xff] (!%p200_p6)   ;;  %v1494_v18 = vld [vmem:[%s1942_s1 + $0xe0] sm:$0xff] (!%p200_p6)   ;;  %v1498_v22 = vld [vmem:[%s1942_s1 + $0xe8] sm:$0xff] (!%p200_p6)  }
  0x11   : > { %1286 = vmatprep.subr.bf16.mxu0 (!%p200_p6), %v1484_v8  ;;  %v1491_v15 = vld [vmem:[%s1942_s1 + $0x98] sm:$0xff] (!%p200_p6)   ;;  %v1495_v19 = vld [vmem:[%s1942_s1 + $0xa0] sm:$0xff] (!%p200_p6)   ;;  %v1499_v23 = vld [vmem:[%s1942_s1 + $0xa8] sm:$0xff] (!%p200_p6)  }
  0x12   : > { %1307 = vmatpush3.bf16.msra.mxu1 %v1483_v7  ;;  %s239_s7 = scalar_select %p238_p7, %s1725_s11, 2  ;;  %v1500_v24 = vld [vmem:[%s1942_s1 + $0x70] sm:$0xff]   ;;  %v1504_v28 = vld [vmem:[%s1942_s1 + $0x78] sm:$0xff]   ;;  %v1508_v38 = vld [vmem:[%s1942_s1 + $0x140] sm:$0xff]  }
  0x13   : > { %1308 = vmatprep.subr.bf16.mxu1 %v1486_v10  ;;  %v1501_v25 = vld [vmem:[%s1942_s1 + $0x30] sm:$0xff]   ;;  %v1505_v29 = vld [vmem:[%s1942_s1 + $0x38] sm:$0xff]   ;;  %v1509_v42 = vld [vmem:[%s1942_s1 + $0x100] sm:$0xff]   ;;  %s1274_s28 = sshll.u32 (%p1678_p4), %s1666_s21, 3 }
  0x14   : > { %1287 = vmatpush3.bf16.msra.mxu0 %v1485_v9  ;;  %s1385_s17 = smul.u32 56, %s239_s7  ;;  %v1502_v26 = vld [vmem:[%s1942_s1 + $0xf0] sm:$0xff]   ;;  %v1506_v30 = vld [vmem:[%s1942_s1 + $0xf8] sm:$0xff]   ;;  %v1510_v47 = vld [vmem:[%s1942_s1 + $0x148] sm:$0xff]   ;;  %s1907_s30 = scalar_lea.vmem (%p1678_p4), %s1946_s5, %s1274_s28  }
  0x15   : > { %1288 = vmatprep.subr.bf16.mxu0 %v1488_v12  ;;  %v1503_v27 = vld [vmem:[%s1942_s1 + $0xb0] sm:$0xff]   ;;  %v1507_v34 = vld [vmem:[%s1942_s1 + $0xb8] sm:$0xff]   ;;  %v1511_v48 = vld [vmem:[%s1942_s1 + $0x108] sm:$0xff]  }
  0x16   : > { %1309 = vmatpush3.bf16.msra.mxu1 %v1487_v11  ;;  %s1777_s9 = scalar_lea.vmem %s1941_s0, %s1385_s17  ;;  %v1512_v49 = vld [vmem:[%s1942_s1 + $0x150] sm:$0xff]   ;;  %v1514_v51 = vld [vmem:[%s1942_s1 + $0x158] sm:$0xff]   ;;  %v1516_v53 = vld [vmem:[%s1942_s1 + $0x160] sm:$0xff]   ;;  %s229_s17 = sand.u32 1, %s1579_s18  }
  0x17   : > { %1310 = vmatprep.subr.bf16.mxu1 %v1490_v14  ;;  %v256_v31 = vld [vmem:[%s1777_s9 + $0x8] sm:$0xff]  ;;  %v263_v32 = vld [vmem:[%s1777_s9 + $0x40] sm:$0xff]  ;;  %v262_v36 = vld [vmem:[%s1777_s9 + $0x38] sm:$0xff]  ;;  %s1190_s24 = sshll.u32 %s229_s17, 3  ;;  %s976_s18 = ssub.s32 (%p1678_p4), 3, %s1725_s11 }
  0x18   : > { %1289 = vmatpush3.bf16.msra.mxu0 %v1489_v13  ;;  %v270_v33 = vpack.c.bf16 %v263_v32, %v256_v31  ;;  %v255_v35 = vld [vmem:[%s1777_s9] sm:$0xff]  ;;  %v258_v39 = vld [vmem:[%s1777_s9 + $0x18] sm:$0xff]  ;;  %v265_v40 = vld [vmem:[%s1777_s9 + $0x50] sm:$0xff]  ;;  %s1897_s27 = scalar_lea.vmem [#allocation2], %s1190_s24   ;;  %p977_p8 = scmp.lt.s32.totalorder (%p1678_p4), %s976_s18, 2 }
  0x19   : > { %1290 = vmatprep.subr.bf16.mxu0 %v1492_v16  ;;  %v269_v37 = vpack.c.bf16 %v262_v36, %v255_v35  ;;  %v272_v41 = vpack.c.bf16 %v265_v40, %v258_v39  ;;  %v257_v44 = vld [vmem:[%s1777_s9 + $0x10] sm:$0xff]  ;;  %v264_v45 = vld [vmem:[%s1777_s9 + $0x48] sm:$0xff]  ;;  %v1515_v52 = vld [vmem:[%s1942_s1 + $0x118] sm:$0xff]  }
  0x1a   : > { %1311 = vmatpush3.bf16.msra.mxu1 %v1491_v15  ;;  %711 = vmatprep.mubr.bf16.mxu0 %v270_v33  ;;  %v271_v46 = vpack.c.bf16 %v264_v45, %v257_v44  ;;  %v1513_v50 = vld [vmem:[%s1942_s1 + $0x110] sm:$0xff]   ;;  %v1517_v54 = vld [vmem:[%s1942_s1 + $0x120] sm:$0xff]   ;;  %v1518_v55 = vld [vmem:[%s1942_s1 + $0x168] sm:$0xff]  }
  0x1b   : > { %1312 = vmatprep.subr.bf16.mxu1 %v1494_v18  ;;  %752 = vmatprep.mubr.bf16.mxu1 %v272_v41  ;;  %v1524_v56 = vld [vmem:[%s1942_s1 + $0x180] sm:$0xff]   ;;  %v260_v57 = vld [vmem:[%s1777_s9 + $0x28] sm:$0xff]  ;;  %v1520_v59 = vld [vmem:[%s1942_s1 + $0x170] sm:$0xff]  }
  0x1c   : > { %1291 = vmatpush3.bf16.msra.mxu0 %v1493_v17  ;;  %v1519_v58 = vld [vmem:[%s1942_s1 + $0x128] sm:$0xff]   ;;  %v267_v60 = vld [vmem:[%s1777_s9 + $0x60] sm:$0xff]  ;;  %v261_v62 = vld [vmem:[%s1777_s9 + $0x30] sm:$0xff] }
  0x1d   : > { %1292 = vmatprep.subr.bf16.mxu0 %v1496_v20  ;;  %v274_v61 = vpack.c.bf16 %v267_v60, %v260_v57  ;;  %v268_v63 = vld [vmem:[%s1777_s9 + $0x68] sm:$0xff]  ;;  %v1521_v1 = vld [vmem:[%s1942_s1 + $0x130] sm:$0xff]   ;;  %v1522_v2 = vld [vmem:[%s1942_s1 + $0x178] sm:$0xff]  }
  0x1e   : > { %1313 = vmatpush3.bf16.msra.mxu1 %v1495_v19  ;;  %v275_v0 = vpack.c.bf16 %v268_v63, %v261_v62  ;;  %v1523_v3 = vld [vmem:[%s1942_s1 + $0x138] sm:$0xff]   ;;  %v259_v4 = vld [vmem:[%s1777_s9 + $0x20] sm:$0xff]  ;;  %v1526_v8 = vld [vmem:[%s1944_s3 + $0x8] sm:$0xff]  }
  0x1f   : > { %1314 = vmatprep.subr.bf16.mxu1 %v1498_v22  ;;  %v266_v5 = vld [vmem:[%s1777_s9 + $0x58] sm:$0xff]  ;;  %v1525_v7 = vld [vmem:[%s1944_s3] sm:$0xff]   ;;  %v1527_v9 = vld [vmem:[%s1944_s3 + $0x10] sm:$0xff]  }
  0x20   : > { %1293 = vmatpush3.bf16.msra.mxu0 %v1497_v21  ;;  %v273_v6 = vpack.c.bf16 %v266_v5, %v259_v4  ;;  %v1528_v10 = vld [vmem:[%s1944_s3 + $0x18] sm:$0xff]   ;;  %v1529_v11 = vld [vmem:[%s1944_s3 + $0x20] sm:$0xff]   ;;  %v1530_v12 = vld [vmem:[%s1944_s3 + $0x28] sm:$0xff]  }
  0x21   : > { %1294 = vmatprep.subr.bf16.mxu0 %v1500_v24  ;;  %v1531_v13 = vld [vmem:[%s1944_s3 + $0x30] sm:$0xff]   ;;  %v1532_v14 = vld [vmem:[%s1944_s3 + $0x38] sm:$0xff]   ;;  %v1193_v16 = vld [vmem:[%s1943_s2] ss:$0 sm:$0xff] }
  0x22   : > { %1315 = vmatpush3.bf16.msra.mxu1 %v1499_v23 }
  0x23   : > { %1316 = vmatprep.subr.bf16.mxu1 %v1502_v26 }
  0x24   : > { %1295 = vmatpush3.bf16.msra.mxu0 %v1501_v25 }
  0x25   : > { %1296 = vmatprep.subr.bf16.mxu0 %v1504_v28 }
  0x26   : > { %1317 = vmatpush3.bf16.msra.mxu1 %v1503_v27 }
  0x27   : > { %1318 = vmatprep.subr.bf16.mxu1 %v1506_v30 }
  0x28   : > { %1297 = vmatpush3.bf16.msra.mxu0 %v1505_v29 }
  0x29   : > { %1326 = vmatprep.subr.bf16.mxu0 %v1508_v38 }
  0x2a   : > { %1319 = vmatpush3.bf16.msra.mxu1 %v1507_v34 }
  0x2b   : > { %1359 = vmatprep.subr.bf16.mxu1 %v1621_v43  ;;  %712 = vmatmul.mubr.bf16.vlgmr.msra.gmra.mrb[0].mxu0 %v269_v37 }
  0x2c   : > { %1327 = vmatpush3.bf16.msra.mxu0 %v1509_v42  ;;  %793 = vmatprep.mubr.bf16.mxu0 %v274_v61 }
  0x2d   : > { %753 = vmatmul.mubr.bf16.vlgmr.msra.gmra.mrb[0].mxu1 %v271_v46  ;;  %1328 = vmatprep.subr.bf16.mxu0 %v1510_v47 }
  0x2e   : > { %1361 = vmatprep.mubr.msk.bf16.mxu1 %vm1622_vm0, %v1621_v43  ;;  %1360 = vmatpush3.bf16.msra.mxu1 %v1524_v56 }
  0x2f   : > { %1365 = vmatprep.subr.bf16.mxu1 %v1621_v43 }
  0x30   : > { %1329 = vmatpush3.bf16.msra.mxu0 %v1511_v48 }
  0x31   : > { %1330 = vmatprep.subr.bf16.mxu0 %v1512_v49  ;;  %v1244_v49 = vld [vmem:[%s1945_s4] ss:$0 sm:$0xff] }
  0x34   : > { %1331 = vmatpush3.bf16.msra.mxu0 %v1513_v50 }
  0x35   : > { %1332 = vmatprep.subr.bf16.mxu0 %v1514_v51  ;;  %1362 = vmatmul.mubr.msk.bf16.vlgmr.msra.gmra.mrb[4].mxu1 %vm675_vm1, %v275_v0 }
  0x36   : > { %1381 = vmatprep.mubr.msk.bf16.mxu1 %vm1622_vm0, %v1621_v43  ;;  %1366 = vmatpush3.bf16.msra.mxu1 %v1525_v7 }
  0x37   : > { %1367 = vmatprep.subr.bf16.mxu1 %v1621_v43 }
  0x38   : > { %1333 = vmatpush3.bf16.msra.mxu0 %v1515_v52 }
  0x39   : > { %1334 = vmatprep.subr.bf16.mxu0 %v1516_v53 }
  0x3a   : > { %1368 = vmatpush3.bf16.msra.mxu1 %v1526_v8 }
  0x3b   : > { %1369 = vmatprep.subr.bf16.mxu1 %v1621_v43 }
  0x3c   : > { %1335 = vmatpush3.bf16.msra.mxu0 %v1517_v54 }
  0x3d   : > { %1336 = vmatprep.subr.bf16.mxu0 %v1518_v55 }
  0x3e   : > { %1370 = vmatpush3.bf16.msra.mxu1 %v1527_v9 }
  0x3f   : > { %1371 = vmatprep.subr.bf16.mxu1 %v1621_v43 }
  0x40   : > { %1337 = vmatpush3.bf16.msra.mxu0 %v1519_v58 }
  0x41   : > { %1338 = vmatprep.subr.bf16.mxu0 %v1520_v59 }
  0x42   : > { %1372 = vmatpush3.bf16.msra.mxu1 %v1528_v10 }
  0x43   : > { %1373 = vmatprep.subr.bf16.mxu1 %v1621_v43 }
  0x44   : > { %1339 = vmatpush3.bf16.msra.mxu0 %v1521_v1 }
  0x45   : > { %1340 = vmatprep.subr.bf16.mxu0 %v1522_v2 }
  0x46   : > { %1374 = vmatpush3.bf16.msra.mxu1 %v1529_v11 }
  0x47   : > { %1375 = vmatprep.subr.bf16.mxu1 %v1621_v43 }
  0x48   : > { %1341 = vmatpush3.bf16.msra.mxu0 %v1523_v3 }
  0x4a   : > { %1376 = vmatpush3.bf16.msra.mxu1 %v1530_v12 }
  0x4b   : > { %794 = vmatmul.mubr.bf16.vlgmr.msra.gmra.mrb[4].mxu0 %v273_v6  ;;  %1377 = vmatprep.subr.bf16.mxu1 %v1621_v43 }
  0x4e   : > { %1378 = vmatpush3.bf16.msra.mxu1 %v1531_v13 }
  0x4f   : > { %1379 = vmatprep.subr.bf16.mxu1 %v1621_v43 }
  0x52   : > { %1380 = vmatpush3.bf16.msra.mxu1 %v1532_v14 }
  0xfe   : > { %v1298_v15 = vpop.f32.mrb[0].mxu0 }
  0xff   : > { %v1299_v17 = vpop.f32.mrb[1].mxu0 }
 0x100   : > { %v1300_v18 = vadd.f32 %v1299_v17, %v1298_v15  ;;  %v1301_v19 = vpop.f32.mrb[2].mxu0  ;;  %v1320_v20 = vpop.f32.mrb[0].mxu1 }
 0x101   : > { %v1302_v21 = vpop.f32.mrb[3].mxu0  ;;  %v1321_v24 = vpop.f32.mrb[1].mxu1 }
 0x102   : > { %v714_v22 = vadd.f32 %v1300_v18, %v1193_v16  ;;  %v1303_v23 = vadd.f32 %v1302_v21, %v1301_v19  ;;  %v1322_v25 = vadd.f32 %v1321_v24, %v1320_v20  ;;  %v1323_v26 = vpop.f32.mrb[2].mxu1 }
 0x103   : > { %v1324_v28 = vpop.f32.mrb[3].mxu1 }
 0x104   : > { %v717_v27 = vadd.f32 %v1303_v23, %v1193_v16  ;;  %v755_v29 = vadd.f32 %v1322_v25, %v714_v22  ;;  %v1325_v30 = vadd.f32 %v1324_v28, %v1323_v26 }
 0x106   : > { %v758_v31 = vadd.f32 %v1325_v30, %v717_v27 }
 0x108   : > { %v836_v32 = vpop.f32.mrb[4].mxu1 }
 0x109   : > { %v1363_v33 = vpop.f32.mrb[5].mxu1 }
 0x10a   : > { %v839_v34 = vpop.f32.mrb[6].mxu1 }
 0x10b   : > { %v1364_v35 = vpop.f32.mrb[7].mxu1 }
 0x11e   : > { %v1342_v36 = vpop.f32.mrb[4].mxu0 }
 0x11f   : > { %v1343_v37 = vpop.f32.mrb[5].mxu0 }
 0x120   : > { %v1344_v38 = vadd.f32 %v1343_v37, %v1342_v36  ;;  %v1345_v39 = vpop.f32.mrb[6].mxu0 }
 0x121   : > { %v1346_v40 = vpop.f32.mrb[7].mxu0 }
 0x122   : > { %v796_v41 = vadd.f32 %v1344_v38, %v755_v29  ;;  %v1347_v42 = vadd.f32 %v1346_v40, %v1345_v39 }
 0x124   : > { %v837_v43 = vadd.f32 %v836_v32, %v796_v41  ;;  %v799_v44 = vadd.f32 %v1347_v42, %v758_v31 }
 0x126   : > { %v840_v45 = vadd.f32 %v839_v34, %v799_v44  ;;  %v843_v46 = vmax.f32 %v837_v43, 0.0 }
 0x128   : > { %v844_v47 = vmax.f32 %v840_v45, 0.0 }
 0x12a   : > { %v845_v48 = vpack.c.bf16 %v844_v47, %v843_v46 }
 0x12c   : > { %1382 = vmatmul.mubr.bf16.vlgmr.msra.gmra.mrb[8].mxu1 %v845_v48 }
 0x1ff   : > { %v951_v50 = vpop.f32.mrb[8].mxu1 }
 0x200   : > { %v1383_v51 = vpop.f32.mrb[9].mxu1  ;;  %v952_v53 = vadd.f32 %v1244_v49, %v951_v50  ;;  %974 = sbr.rel (!%p1678_p4) target bundleno = 568 (0x238), region = 44 }
 0x201   : > { %v954_v52 = vpop.f32.mrb[10].mxu1 }
 0x202   : > { %v955_v54 = vadd.f32 %v1244_v49, %v954_v52  ;;  %v1384_v55 = vpop.f32.mrb[11].mxu1 }
 0x204   : > { %v1280_v56 = vpack.c.bf16 %v955_v54, %v952_v53 }
 0x206   : > { %1281 = vst [vmem:[%s1897_s27] sm:$0xff] %v1280_v56  }
 0x207   : > { %s1952_s18 = smov (!%p977_p8, %s976_s18), 2 }
 0x208   : > { %s1257_s6 = sshll.u32 %s1952_s18, 6 }
 0x209   : > { %p1260_p9 = scmp.eq.s32.totalorder %s1257_s6, 0 }
 0x20a   : > { %s1913_s7 = sshrl.u32 (!%p1260_p9), %s1952_s18, 1 }
 0x20b   : > { %985 = sbr.rel (%p1260_p9) target bundleno = 568 (0x238), region = 48  ;;  %p1261_p10 = scmp.le.s32.totalorder (!%p1260_p9), %s1913_s7, 0 }
 0x212   : > { %1142 = sbr.rel (%p1261_p10) target bundleno = 547 (0x223), region = 120  ;;  %s1589_s21 = smov (!%p1261_p10), %s1907_s30  }
 0x213   : > { %s1593_s26 = smov (!%p1261_p10), %s1897_s27   ;;  %s1597_s11 = smov (!%p1261_p10), 0  }
 0x214   : > { %s1601_s8 = smov (!%p1261_p10), 0  }
 0x219 LB: >> { %v1001_v57 = vld [vmem:[%s1595_s26] sm:$0xf]  ;;  %v1003_v58 = vld [vmem:[%s1595_s26 + $0x4] sm:$0xf]  ;;  %s1005_s10 = sadd.s32 1, %s1599_s11  ;;  %s995_s8 = sadd.s32 1, %s1603_s8   ;;  %s1603_s8 = sphi %s1601_s8, %s995_s8   ;;  %s1599_s11 = sphi %s1597_s11, %s1598_s11   ;;  %s1595_s26 = sphi %s1593_s26, %s1010_s26   ;;  %s1591_s21 = sphi %s1589_s21, %s1011_s21  }
 0x21a   : >> { %1002 = vst [vmem:[%s1591_s21] sm:$0xf] %v1001_v57  ;;  %1004 = vst [vmem:[%s1591_s21 + $0x4] sm:$0xf] %v1003_v58  ;;  %p1006_p11 = scmp.ge.s32.totalorder %s1005_s10, %s1913_s7  ;;  %p994_p12 = scmp.ge.s32.totalorder %s995_s8, %s1913_s7 }
 0x21c   : >> { %s1954_s10 = smov (%p1006_p11, %s1005_s10), 0  ;;  %997 = sbr.rel (!%p994_p12) target bundleno = 537 (0x219), region = 126 }
 0x21d   : >> { %s1262_s12 = sshll.u32 %s1954_s10, 3  ;;  %s1598_s11 = smov %s1954_s10  }
 0x21e   : >> { %s1010_s26 = scalar_lea.vmem %s1897_s27, %s1262_s12 [#allocation2]   ;;  %s1011_s21 = scalar_lea.vmem %s1907_s30, %s1262_s12  }
 0x223 PF: > { %s1923_s13 = sand.u32 1, %s1952_s18   ;;  %s1275_s14 = sshll.u32 %s1913_s7, 3 }
 0x224   : > { %s1016_s15 = scalar_lea.vmem %s1897_s27, %s1275_s14 [#allocation2]   ;;  %s1018_s16 = scalar_lea.vmem %s1907_s30, %s1275_s14  }
 0x225   : > { %p1267_p13 = scmp.le.s32.totalorder %s1923_s13, 0 }
 0x226   : > { %s1605_s17 = smov (!%p1267_p13), %s1018_s16   ;;  %s1609_s20 = smov (!%p1267_p13), %s1016_s15  }
 0x227   : > { %1156 = sbr.rel (%p1267_p13) target bundleno = 568 (0x238), region = 131  ;;  %s1613_s23 = smov (!%p1267_p13), 0  }
 0x228   : > { %s1617_s24 = smov (!%p1267_p13), 0  }
 0x22e LB: >> { %v1028_v59 = vld [vmem:[%s1611_s20] sm:$0xf]  ;;  %s1030_s18 = sadd.s32 1, %s1615_s23  ;;  %s1022_s24 = sadd.s32 1, %s1619_s24   ;;  %s1619_s24 = sphi %s1617_s24, %s1022_s24   ;;  %s1615_s23 = sphi %s1613_s23, %s1614_s23   ;;  %s1611_s20 = sphi %s1609_s20, %s1035_s20   ;;  %s1607_s17 = sphi %s1605_s17, %s1036_s17  }
 0x22f   : >> { %1029 = vst [vmem:[%s1607_s17] sm:$0xf] %v1028_v59  ;;  %p1031_p0 = scmp.ge.s32.totalorder %s1030_s18, %s1923_s13  ;;  %p1021_p1 = scmp.ge.s32.totalorder %s1022_s24, %s1923_s13 }
 0x231   : >> { %s1956_s18 = smov (%p1031_p0, %s1030_s18), 0  ;;  %1024 = sbr.rel (!%p1021_p1) target bundleno = 558 (0x22e), region = 137 }
 0x232   : >> { %s1268_s27 = sshll.u32 %s1956_s18, 2  ;;  %s1614_s23 = smov %s1956_s18  }
 0x233   : >> { %s1035_s20 = scalar_lea.vmem %s1016_s15, %s1268_s27 [#allocation2]   ;;  %s1036_s17 = scalar_lea.vmem %s1018_s16, %s1268_s27  }
 0x238 PF: > { %p12_p2 = scmp.ge.s32.totalorder %s1668_s22, 4   ;;  %s1948_s18 = smov %s1583_s19 }
 0x239   : > { %s1949_s19 = smov %s1676_s25  ;;  %s1950_s20 = smov %s1668_s22 }
 0x23a   :  { %14 = sbr.rel (!%p12_p2) target bundleno = 2 (0x2), region = 148 }

</bundles_post_ra>
